<compile_context>
chip_gen: v6e
topology: v6e:2x2x1
jax: 0.10.0
libtpu: 0.0.40
codegen_flags: <defaults>
</compile_context>

<pallas_src>
import jax
import jax.numpy as jnp
from jax.experimental import pallas as pl
from jax.experimental.pallas import tpu as pltpu

LANE = 128      # vreg lane width
SUBLANE = 8     # f32 sublane tile

# Fixed layer2 weights from the PyTorch module spec (hidden_size must be 10).
WEIGHT1 = [[1, 1, 1, 1, 1, -1, -1, -1, -1, -1]]


def _round_up(n, m):
    return (n + m - 1) // m * m


def mlp_kernel(x_ref, w1_ref, b1_ref, w2_ref, o_ref):
    # Layer 1: one MXU pass (f32 accumulation); bias + ReLU on the VPU in f32.
    h = jnp.dot(x_ref[...], w1_ref[...], preferred_element_type=jnp.float32)
    h = jnp.maximum(h + b1_ref[...], 0.0)                       # (tm, Hp) f32
    # Layer 2 (O == 1): VPU multiply + XLU cross-lane reduce; store the
    # compact (tm, 1) result directly (4 B/row writeback).
    o_ref[...] = jnp.sum(h * w2_ref[...], axis=-1, keepdims=True)


def two_layer_net(x, w1, b1, w2, *, tm=None, matmul_dtype=None):
    """Forward pass of TwoLayerNet.

    x:(B,D) f32; w1:(D,H); b1:(1,H); w2:(H,1).  Returns (B,1) f32.
    matmul_dtype: optionally jnp.bfloat16 at real sizes to halve the dominant
      x HBM stream (f32 accumulation/epilogue kept; not bit-exact vs. f32).
    """
    B, D = x.shape
    H = w1.shape[1]
    O = w2.shape[1]
    assert w1.shape == (D, H) and b1.shape == (1, H) and w2.shape == (H, O)
    assert O == 1, "kernel's second layer is specialized for output_size == 1"

    # Lane-pad only the hidden dim (weights are tiny, pad is ~free and exact).
    Hp = _round_up(max(H, LANE), LANE)

    # Batch tile: aim for >= 4 grid steps (v7x megacore sharding), cap at 2048
    # rows to amortize per-step pipeline overhead; multiple of the sublane tile.
    if tm is None:
        tm = min(2048, _round_up(pl.cdiv(B, 4), SUBLANE))
    tm = max(SUBLANE, _round_up(tm, SUBLANE))
    Bp = _round_up(B, tm)

    in_dtype = jnp.dtype(jnp.float32 if matmul_dtype is None else matmul_dtype)
    xk = x.astype(in_dtype)
    if Bp != B:                       # pad batch rows only when B % tm != 0
        xk = jnp.pad(xk, ((0, Bp - B), (0, 0)))
    w1p = jnp.zeros((D, Hp), in_dtype).at[:, :H].set(w1.astype(in_dtype))
    b1p = jnp.zeros((1, Hp), jnp.float32).at[:, :H].set(b1)
    w2p = jnp.zeros((1, Hp), jnp.float32).at[:, :H].set(w2[:, 0][None, :])

    grid = (Bp // tm,)
    flops = 2 * Bp * D * Hp + 4 * Bp * Hp
    bytes_accessed = (Bp * D + D * Hp) * in_dtype.itemsize + (2 * Hp + Bp) * 4

    out = pl.pallas_call(
        mlp_kernel,
        out_shape=jax.ShapeDtypeStruct((Bp, 1), jnp.float32),
        grid=grid,
        in_specs=[
            # x streamed in tm-row tiles at its true width D (no HBM copy).
            pl.BlockSpec((tm, D), lambda i: (i, 0)),
            # Weights VMEM-resident across the grid (constant index maps).
            pl.BlockSpec((D, Hp), lambda i: (0, 0)),
            pl.BlockSpec((1, Hp), lambda i: (0, 0)),
            pl.BlockSpec((1, Hp), lambda i: (0, 0)),
        ],
        # Compact output block: last dim 1 == full array dim -> legal.
        out_specs=pl.BlockSpec((tm, 1), lambda i: (i, 0)),
        compiler_params=pltpu.CompilerParams(
            dimension_semantics=("parallel",),   # megacore sharding on v7x
            vmem_limit_bytes=48 * 1024 * 1024,   # safe on v5e/v6e/v7x
        ),
        cost_estimate=pl.CostEstimate(
            flops=flops, transcendentals=0, bytes_accessed=bytes_accessed),
    )(xk, w1p, b1p, w2p)

    return out[:B, :]


def init_params(key, input_size, hidden_size):
    # Matches the PyTorch __init__:
    #   layer1.weight ~ Normal(0, 1e-5), layer1.bias ~ Normal(0, 0) == zeros
    #   layer2.weight = WEIGHT1 (fixed, no bias)
    assert hidden_size == len(WEIGHT1[0]), (
        "layer2 weights are fixed for hidden_size == 10")
    w1 = jax.random.normal(key, (hidden_size, input_size), jnp.float32) * 1e-5
    b1 = jnp.zeros((1, hidden_size), jnp.float32)
    w2 = jnp.array(WEIGHT1, dtype=jnp.float32)            # (1, H) == layer2.weight
    # Store transposed for row-major matmuls inside the kernel.
    return w1.T, b1, w2.T                                  # (D, H), (1, H), (H, 1)


if __name__ == "__main__":
    input_size, hidden_size, output_size = 16, 10, 1
    batch = 8

    key = jax.random.PRNGKey(0)
    kx, kw = jax.random.split(key)
    x = jax.random.normal(kx, (batch, input_size), jnp.float32)
    w1, b1, w2 = init_params(kw, input_size, hidden_size)

    out = two_layer_net(x, w1, b1, w2)
    out = jax.block_until_ready(out)

    # Reference: same math as the PyTorch forward.
    ref = jnp.maximum(x @ w1 + b1, 0.0) @ w2
    assert out.shape == (batch, output_size)
    assert jnp.allclose(out, ref, atol=1e-6, rtol=1e-5), float(
        jnp.max(jnp.abs(out - ref)))

    print("KERNEL_OK")
</pallas_src>

<mosaic_0001>
module attributes {stable_mosaic.version = 11 : i64} {
  func.func @mlp_kernel(%arg0: i32, %arg1: memref<8x16xf32, #tpu.memory_space<vmem>>, %arg2: memref<16x128xf32, #tpu.memory_space<vmem>>, %arg3: memref<1x128xf32, #tpu.memory_space<vmem>>, %arg4: memref<1x128xf32, #tpu.memory_space<vmem>>, %arg5: memref<8x1xf32, #tpu.memory_space<vmem>>) attributes {dimension_semantics = [#tpu.dimension_semantics<parallel>], iteration_bounds = array<i64: 1>, scalar_prefetch = 0 : i64, scratch_operands = 0 : i64, tpu.core_type = #tpu.core_type<tc>, window_params = [{transform_indices = @transform_0, window_bounds = array<i64: 8, 16>}, {pipeline_mode = #tpu.pipeline_mode<synchronous>, transform_indices = @transform_1, window_bounds = array<i64: 16, 128>}, {pipeline_mode = #tpu.pipeline_mode<synchronous>, transform_indices = @transform_2, window_bounds = array<i64: 1, 128>}, {pipeline_mode = #tpu.pipeline_mode<synchronous>, transform_indices = @transform_3, window_bounds = array<i64: 1, 128>}, {transform_indices = @transform_4, window_bounds = array<i64: 8, 1>}]} {
    %c0 = arith.constant 0 : index
    %c0_0 = arith.constant 0 : index
    %0 = vector.load %arg1[%c0, %c0_0] : memref<8x16xf32, #tpu.memory_space<vmem>>, vector<8x16xf32>
    %c0_1 = arith.constant 0 : index
    %c0_2 = arith.constant 0 : index
    %1 = vector.load %arg2[%c0_1, %c0_2] : memref<16x128xf32, #tpu.memory_space<vmem>>, vector<16x128xf32>
    %cst = arith.constant dense<0.000000e+00> : vector<8x128xf32>
    %2 = tpu.matmul %0, %1, %cst {dimension_numbers = #tpu.dot_dimension_numbers<[1], [0], [0], [1], [0, 0, 1, 1], [], []>} : vector<8x16xf32>, vector<16x128xf32>, vector<8x128xf32> -> vector<8x128xf32>
    %c0_3 = arith.constant 0 : index
    %c0_4 = arith.constant 0 : index
    %3 = vector.load %arg3[%c0_3, %c0_4] : memref<1x128xf32, #tpu.memory_space<vmem>>, vector<1x128xf32>
    %4 = vector.broadcast %3 : vector<1x128xf32> to vector<8x128xf32>
    %5 = arith.addf %2, %4 : vector<8x128xf32>
    %cst_5 = arith.constant 0.000000e+00 : f32
    %6 = vector.broadcast %cst_5 : f32 to vector<8x128xf32>
    %7 = arith.maximumf %5, %6 : vector<8x128xf32>
    %c0_6 = arith.constant 0 : index
    %c0_7 = arith.constant 0 : index
    %8 = vector.load %arg4[%c0_6, %c0_7] : memref<1x128xf32, #tpu.memory_space<vmem>>, vector<1x128xf32>
    %9 = vector.broadcast %8 : vector<1x128xf32> to vector<8x128xf32>
    %10 = arith.mulf %7, %9 : vector<8x128xf32>
    %cst_8 = arith.constant dense<0.000000e+00> : vector<8xf32>
    %11 = vector.multi_reduction <add>, %10, %cst_8 [1] : vector<8x128xf32> to vector<8xf32>
    %12 = vector.shape_cast %11 : vector<8xf32> to vector<8x1xf32>
    %c0_9 = arith.constant 0 : index
    %c0_10 = arith.constant 0 : index
    %13 = vector.load %arg5[%c0_9, %c0_10] : memref<8x1xf32, #tpu.memory_space<vmem>>, vector<8x1xf32>
    tpu.vector_store %arg5[%c0_9, %c0_10], %12 {strides = array<i32>} : memref<8x1xf32, #tpu.memory_space<vmem>>, vector<8x1xf32>,
    return
  }
  func.func @transform_0(%arg0: i32) -> (i32, i32) {
    %c0_i32 = arith.constant 0 : i32
    %c0_i32_0 = arith.constant 0 : i32
    return %arg0, %c0_i32 : i32, i32
  }
  func.func @transform_1(%arg0: i32) -> (i32, i32) {
    %c0_i32 = arith.constant 0 : i32
    %c0_i32_0 = arith.constant 0 : i32
    %c0_i32_1 = arith.constant 0 : i32
    return %c0_i32, %c0_i32_0 : i32, i32
  }
  func.func @transform_2(%arg0: i32) -> (i32, i32) {
    %c0_i32 = arith.constant 0 : i32
    %c0_i32_0 = arith.constant 0 : i32
    %c0_i32_1 = arith.constant 0 : i32
    return %c0_i32, %c0_i32_0 : i32, i32
  }
  func.func @transform_3(%arg0: i32) -> (i32, i32) {
    %c0_i32 = arith.constant 0 : i32
    %c0_i32_0 = arith.constant 0 : i32
    %c0_i32_1 = arith.constant 0 : i32
    return %c0_i32, %c0_i32_0 : i32, i32
  }
  func.func @transform_4(%arg0: i32) -> (i32, i32) {
    %c0_i32 = arith.constant 0 : i32
    %c0_i32_0 = arith.constant 0 : i32
    return %arg0, %c0_i32 : i32, i32
  }
}

</mosaic_0001>

<bundles_post_ra>
// kernel: tpu_custom_call.1
= control target key start
LH: loop header
LB: loop body
LE: loop exit
PB: predicated region body
PF: predicated region fallthrough
CT: control target
= control target key end

     0   :  { %9 = vsyncpa [#allocation3], 0  ;;  %s255_s0 = inlined_call_operand.hbm [shape: f32[8,16], index: 0, kind: input, shape index: {}]   ;;  %s256_s1 = inlined_call_operand.hbm [shape: f32[16,128], index: 1, kind: input, shape index: {}]   ;;  %s257_s2 = inlined_call_operand.vmem [shape: f32[1,128], index: 2, kind: input, shape index: {}]   ;;  %s258_s3 = inlined_call_operand.vmem [shape: f32[1,128], index: 3, kind: input, shape index: {}]   ;;  %s259_s4 = inlined_call_operand.vmem [shape: f32[8,1], index: 4, kind: output, shape index: {}]  }
   0x1   :  { %10 = vsyncpa [#allocation5], 0  ;;  %s209_s15 = smov [#allocation2]   ;;  %s210_s17 = smov [#allocation4]  }
   0x2   :  { %s17_s16 = sshll.u32 %s209_s15, 4  ;;  %s26_s18 = sshll.u32 %s210_s17, 4  ;;  %s18_s16 = int_to_ptr.vmem [resolvable:$true] %s17_s16  ;;  %s27_s18 = int_to_ptr.vmem [resolvable:$true] %s26_s18 }
   0x3   :  { %s173_s19 = scalar_lea.vmem %s18_s16, 128  ;;  %p178_p1 = scmp.lt.s32.totalorder %s18_s16, %s18_s16 }
   0x4   :  { %p174_p0 = scmp.ne.s32.totalorder %s18_s16, %s173_s19  ;;  %p179_p2 = scmp.lt.s32.totalorder %s173_s19, %s173_s19 }
   0x6   :  { %p180_p3 = por %p179_p2, %p178_p1 }
   0x8   :  { %p181_p4 = pnand %p180_p3, %p174_p0 }
   0xa   :  { %184 = shalt.err (!%p181_p4)
}
   0xb   :  { %20 = dma.hbm_to_vmem [thread:$0]  %s255_s0, 128, %s18_s16, [#allocation3]  }
   0xc   :  { %s193_s22 = scalar_lea.vmem %s27_s18, 256  ;;  %p198_p6 = scmp.lt.s32.totalorder %s27_s18, %s27_s18 }
   0xd   :  { %p194_p5 = scmp.ne.s32.totalorder %s27_s18, %s193_s22  ;;  %p199_p7 = scmp.lt.s32.totalorder %s193_s22, %s193_s22 }
   0xf   :  { %p200_p8 = por %p199_p7, %p198_p6 }
  0x11   :  { %p201_p9 = pnand %p200_p8, %p194_p5 }
  0x13   :  { %204 = shalt.err (!%p201_p9)
}
  0x14   :  { %s211_s23 = smov 128   ;;  %s212_s24 = smov 8  }
  0x15   :  { %32 = dma.hbm_to_vmem [thread:$0]  %s256_s1, 256, %s27_s18, [#allocation5], %s211_s23, %s211_s23, %s212_s24  }
  0x16   :  { %205 = dma.done.wait [#allocation3], 128  }
  0x17   :  { %206 = vsyncadd [#allocation3], 4294967168 }
  0x18   :  { %207 = dma.done.wait [#allocation5], 256  }
  0x19   :  { %208 = vsyncadd [#allocation5], 4294967040  ;;  %v213_v0 = vmov 0.0   ;;  %vm214_vm0 = vmmov 0   ;;  %v45_v1 = vld [vmem:[#allocation4 + $0x8] sm:$0xff]  ;;  %v44_v2 = vld [vmem:[#allocation4] sm:$0xff] }
  0x1a   :  { %152 = vmatprep.subr.mxu0 %v213_v0  ;;  %156 = vmatprep.mubr.msk.f32.mxu0 %vm214_vm0, %v213_v0  ;;  %v43_v3 = vld [vmem:[#allocation2] sm:$0xff]  ;;  %vm53_vm1 = vcmask 130048   ;;  %vm138_vm2 = vcmask 7168  }
  0x1b   :  { %153 = vmatpush3.msra.mxu0 %v45_v1  ;;  %v146_v4 = vld [vmem:[%s257_s2] ss:$0 sm:$0xff] }
  0x1c   :  { %154 = vmatprep.subr.mxu0 %v213_v0  ;;  %v148_v8 = vld [vmem:[%s258_s3] ss:$0 sm:$0xff] }
  0x1d   :  { %155 = vmatpush3.msra.mxu0 %v44_v2 }
  0x1e   :  { %157 = vmatmul.mubr.msk.f32.vlgmr.msra.gmra.mxu0 %vm53_vm1, %v43_v3 }
  0xde   :  { %v123_v5 = vpop.f32.mrf.mxu0 }
  0xdf   :  { %v124_v6 = vadd.f32 %v146_v4, %v123_v5 }
  0xe0   :  { %v158_v7 = vpop.f32.mrf.mxu0 }
  0xe1   :  { %v127_v9 = vmax.f32 %v124_v6, 0.0 }
  0xe3   :  { %v135_v10 = vmul.f32 %v148_v8, %v127_v9 }
  0xe5   :  { %136 = vadd.xlane.f32.xlu0 %v135_v10 }
 0x16e   :  { %v137_v11 = vpop.xlane.xlu0 %136 }
 0x16f   :  { %139 = vst.msk [vmem:[%s259_s4] sm:$0xff] %vm138_vm2, %v137_v11 }
 0x170   :  { %144 = vsyncpa [#allocation3], 1 }
 0x171   :  { %145 = vsyncpa [#allocation5], 1 }

</bundles_post_ra>
